<compile_context>
chip_gen: v5e
topology: v5e:2x2
jax: 0.10.0
libtpu: 0.0.40
codegen_flags: <defaults>
</compile_context>

<pallas_src>
import functools

import jax
import jax.numpy as jnp
import numpy as np
from jax.experimental import pallas as pl
from jax.experimental.pallas import tpu as pltpu


def _eeg_depth_attention_kernel(w_ref, x_ref, o_ref, *, fused):
    # w_ref: (D, D*C) f32 if fused, else (D, D) f32   (resident; 1/C folded in)
    # x_ref / o_ref: (D, C, TW) tile (batch dim squeezed out by the BlockSpec)
    D, C, TW = x_ref.shape
    x = x_ref[...]

    # --- avg-pool over C + zero-padded depth conv, on the MXU (f32 accum) ---
    if fused:
        # (D, C, TW) -> (D*C, TW) is layout-free when C % sublane_pack == 0.
        z = jnp.dot(w_ref[...], x.reshape(D * C, TW),
                    preferred_element_type=jnp.float32,
                    precision=jax.lax.Precision.HIGHEST)            # (D, TW)
    else:
        pooled = jnp.sum(x.astype(jnp.float32), axis=1)             # (D, TW)
        z = jnp.dot(w_ref[...], pooled,
                    preferred_element_type=jnp.float32,
                    precision=jax.lax.Precision.HIGHEST)            # (D, TW)
    # Conv bias intentionally omitted: softmax over D is shift-invariant,
    # so adding a scalar bias is an exact mathematical no-op.

    # --- exact softmax over the depth axis, with the *C rescale folded in ---
    m = jnp.max(z, axis=0, keepdims=True)
    e = jnp.exp(z - m)
    s = (e / jnp.sum(e, axis=0, keepdims=True)) * jnp.float32(C)    # (D, TW)

    # --- fused epilogue: multiply in f32, single cast at the store ---
    o_ref[...] = (s[:, None, :] * x.astype(jnp.float32)).astype(o_ref.dtype)


def _vmem_budgets():
    """Return (I/O budget for tile sizing, scoped-VMEM limit) in bytes."""
    try:
        cap = pltpu.get_tpu_info().vmem_capacity_bytes
    except Exception:
        cap = 64 << 20                       # conservative: v7x has 64 MiB / TC
    vmem_limit = min((cap * 3) // 4, 64 << 20)   # ~48 MiB on v7x, 64 MiB on v5e/v6e
    io_budget = min((cap * 3) // 10, 24 << 20)   # ~19 MiB on v7x, 24 MiB elsewhere
    return io_budget, vmem_limit


def _choose_w_tile(N, W, D, C, itemsize, io_budget):
    """Largest lane-dense (multiple-of-128) W tile that fits the budget while
    keeping enough grid steps to pipeline and feed both v7x TensorCores."""
    if W < 128:
        return W                             # full-dim block (BlockSpec rule)
    # Per-W-lane footprint per pipeline step:
    #   x in + out tiles, double-buffered, in the I/O dtype,
    #   plus f32 intermediates (cast copy / f32 product before the store).
    per_lane = 2 * 2 * D * C * itemsize + 2 * D * C * 4
    cap = max(128, (io_budget // per_lane) // 128 * 128)
    cap = min(cap, 1024)                     # >1024 lanes: ~1% returns; keep steps instead
    tw = min(cap, (W // 128) * 128)
    # Grid-step floor: a few smaller tiles beat one giant tile (pipelining,
    # 2-TC split on v7x).  Don't shrink short sequences below one block.
    min_steps = 8
    while tw > 128 and W > 512 and N * ((W + tw - 1) // tw) < min_steps:
        tw -= 128
    return tw


def eeg_depth_attention(x, conv_w, conv_b=None, *, k: int = 7, tw: int | None = None):
    """x: (N, D, C, W); conv_w: (k,) f32; conv_b: (1,) — accepted for interface
    fidelity but unused: softmax over D is shift-invariant, so the conv bias
    cancels exactly and the output is identical."""
    del conv_b
    N, D, C, W = x.shape
    itemsize = jnp.dtype(x.dtype).itemsize

    # Banded cross-correlation matrix (zero padding k//2) with the pooling 1/C
    # folded in:  band[d, d'] = conv_w[d' - d + k//2] / C, 0 outside the band.
    d_idx = jnp.arange(D)
    tap = d_idx[None, :] - d_idx[:, None] + (k // 2)                 # (D, D)
    band = jnp.where((tap >= 0) & (tap < k),
                     conv_w.astype(jnp.float32)[jnp.clip(tap, 0, k - 1)],
                     jnp.float32(0.0)) / jnp.float32(C)

    # Fuse pooling + conv into a single (D, D*C) MXU matmul when the in-kernel
    # (D, C, TW) -> (D*C, TW) reshape is layout-free (C multiple of the
    # sublane pack for the I/O dtype); otherwise keep the (D, D) band matrix.
    sublane_pack = max(8, 32 // itemsize)
    fused = (C % sublane_pack == 0)
    w_mat = jnp.repeat(band, C, axis=1) if fused else band           # (D, D*C) / (D, D)

    io_budget, vmem_limit = _vmem_budgets()
    if tw is None:
        tw = _choose_w_tile(N, W, D, C, itemsize, io_budget)
    grid = (N, pl.cdiv(W, tw))

    kernel = functools.partial(_eeg_depth_attention_kernel, fused=fused)
    return pl.pallas_call(
        kernel,
        out_shape=jax.ShapeDtypeStruct((N, D, C, W), x.dtype),
        grid=grid,
        in_specs=[
            pl.BlockSpec(w_mat.shape, lambda n, t: (0, 0)),              # resident weights
            pl.BlockSpec((None, D, C, tw), lambda n, t: (n, 0, 0, t)),   # x tile
        ],
        out_specs=pl.BlockSpec((None, D, C, tw), lambda n, t: (n, 0, 0, t)),
        compiler_params=pltpu.CompilerParams(
            dimension_semantics=("parallel", "parallel"),
            vmem_limit_bytes=vmem_limit),
    )(w_mat, x)


def eeg_depth_attention_ref(x, conv_w, conv_b, k=7):
    """Pure-JAX reference mirroring the PyTorch forward (bias included)."""
    N, D, C, W = x.shape
    pooled = jnp.mean(x.astype(jnp.float32), axis=2)                 # (N, D, W)
    pad = k // 2
    padded = jnp.pad(pooled, ((0, 0), (pad, pad), (0, 0)))
    z = conv_b[0] + sum(conv_w[i] * padded[:, i:i + D, :] for i in range(k))
    s = jax.nn.softmax(z, axis=1)                                    # softmax over D
    return (s[:, :, None, :] * C * x.astype(jnp.float32)).astype(x.dtype)


if __name__ == "__main__":
    # Small shapes consistent with the module: N=2 batch, D=8 depth maps,
    # C=16 EEG channels, W=128 time samples, learnable kernel size k=7.
    N, D, C, W, k = 2, 8, 16, 128, 7

    key = jax.random.PRNGKey(0)
    kx, kw, kb = jax.random.split(key, 3)
    x = jax.random.normal(kx, (N, D, C, W), dtype=jnp.float32)

    # Conv2d(1, 1, kernel_size=(k, 1), bias=True): weight (1,1,k,1), bias (1,)
    bound = 1.0 / np.sqrt(k)
    conv_w = jax.random.uniform(kw, (k,), jnp.float32, -bound, bound)
    conv_b = jax.random.uniform(kb, (1,), jnp.float32, -bound, bound)

    out = eeg_depth_attention(x, conv_w, conv_b, k=k)
    out = jax.block_until_ready(out)

    ref = eeg_depth_attention_ref(x, conv_w, conv_b, k=k)
    # Exact softmax + HIGHEST-precision matmul: tight tolerance again.
    np.testing.assert_allclose(np.asarray(out), np.asarray(ref),
                               rtol=1e-4, atol=1e-5)

    print("KERNEL_OK")
</pallas_src>

<mosaic_0001>
module attributes {stable_mosaic.version = 11 : i64} {
  func.func @_eeg_depth_attention_kernel(%arg0: i32, %arg1: i32, %arg2: memref<8x128xf32, #tpu.memory_space<vmem>>, %arg3: memref<1x8x16x128xf32, #tpu.memory_space<vmem>>, %arg4: memref<1x8x16x128xf32, #tpu.memory_space<vmem>>) attributes {dimension_semantics = [#tpu.dimension_semantics<parallel>, #tpu.dimension_semantics<parallel>], iteration_bounds = array<i64: 2, 1>, scalar_prefetch = 0 : i64, scratch_operands = 0 : i64, tpu.core_type = #tpu.core_type<tc>, window_params = [{pipeline_mode = #tpu.pipeline_mode<synchronous>, transform_indices = @transform_0, window_bounds = array<i64: 8, 128>}, {transform_indices = @transform_1, window_bounds = array<i64: 1, 8, 16, 128>}, {transform_indices = @transform_2, window_bounds = array<i64: 1, 8, 16, 128>}]} {
    %c0 = arith.constant 0 : index
    %c0_0 = arith.constant 0 : index
    %c0_1 = arith.constant 0 : index
    %c0_2 = arith.constant 0 : index
    %0 = vector.load %arg3[%c0, %c0_0, %c0_1, %c0_2] : memref<1x8x16x128xf32, #tpu.memory_space<vmem>>, vector<1x8x16x128xf32>
    %1 = vector.shape_cast %0 : vector<1x8x16x128xf32> to vector<8x16x128xf32>
    %c0_3 = arith.constant 0 : index
    %c0_4 = arith.constant 0 : index
    %2 = vector.load %arg2[%c0_3, %c0_4] : memref<8x128xf32, #tpu.memory_space<vmem>>, vector<8x128xf32>
    %3 = vector.shape_cast %1 : vector<8x16x128xf32> to vector<128x128xf32>
    %cst = arith.constant dense<0.000000e+00> : vector<8x128xf32>
    %4 = tpu.matmul %2, %3, %cst {dimension_numbers = #tpu.dot_dimension_numbers<[1], [0], [0], [1], [0, 0, 1, 1], [], []>, precision = #tpu.contract_precision<fp32>} : vector<8x128xf32>, vector<128x128xf32>, vector<8x128xf32> -> vector<8x128xf32>
    %cst_5 = arith.constant dense<0xFF800000> : vector<128xf32>
    %5 = vector.multi_reduction <maximumf>, %4, %cst_5 [0] : vector<8x128xf32> to vector<128xf32>
    %6 = vector.shape_cast %5 : vector<128xf32> to vector<1x128xf32>
    %7 = vector.broadcast %6 : vector<1x128xf32> to vector<8x128xf32>
    %8 = arith.subf %4, %7 : vector<8x128xf32>
    %9 = math.exp %8 : vector<8x128xf32>
    %cst_6 = arith.constant dense<0.000000e+00> : vector<128xf32>
    %10 = vector.multi_reduction <add>, %9, %cst_6 [0] : vector<8x128xf32> to vector<128xf32>
    %11 = vector.shape_cast %10 : vector<128xf32> to vector<1x128xf32>
    %12 = vector.broadcast %11 : vector<1x128xf32> to vector<8x128xf32>
    %13 = arith.divf %9, %12 : vector<8x128xf32>
    %cst_7 = arith.constant 1.600000e+01 : f32
    %14 = vector.broadcast %cst_7 : f32 to vector<8x128xf32>
    %15 = arith.mulf %13, %14 : vector<8x128xf32>
    %16 = vector.shape_cast %15 : vector<8x128xf32> to vector<8x1x128xf32>
    %17 = vector.broadcast %16 : vector<8x1x128xf32> to vector<8x16x128xf32>
    %18 = arith.mulf %17, %1 : vector<8x16x128xf32>
    %c0_8 = arith.constant 0 : index
    %c0_9 = arith.constant 0 : index
    %c0_10 = arith.constant 0 : index
    %c0_11 = arith.constant 0 : index
    %19 = vector.load %arg4[%c0_8, %c0_9, %c0_10, %c0_11] : memref<1x8x16x128xf32, #tpu.memory_space<vmem>>, vector<1x8x16x128xf32>
    %20 = vector.shape_cast %19 : vector<1x8x16x128xf32> to vector<8x16x128xf32>
    %21 = vector.shape_cast %18 : vector<8x16x128xf32> to vector<1x8x16x128xf32>
    tpu.vector_store %arg4[%c0_8, %c0_9, %c0_10, %c0_11], %21 {strides = array<i32>} : memref<1x8x16x128xf32, #tpu.memory_space<vmem>>, vector<1x8x16x128xf32>,
    return
  }
  func.func @transform_0(%arg0: i32, %arg1: i32) -> (i32, i32) {
    %c0_i32 = arith.constant 0 : i32
    %c0_i32_0 = arith.constant 0 : i32
    %c0_i32_1 = arith.constant 0 : i32
    return %c0_i32, %c0_i32_0 : i32, i32
  }
  func.func @transform_1(%arg0: i32, %arg1: i32) -> (i32, i32, i32, i32) {
    %c0_i32 = arith.constant 0 : i32
    %c0_i32_0 = arith.constant 0 : i32
    %c0_i32_1 = arith.constant 0 : i32
    return %arg0, %c0_i32, %c0_i32_0, %arg1 : i32, i32, i32, i32
  }
  func.func @transform_2(%arg0: i32, %arg1: i32) -> (i32, i32, i32, i32) {
    %c0_i32 = arith.constant 0 : i32
    %c0_i32_0 = arith.constant 0 : i32
    %c0_i32_1 = arith.constant 0 : i32
    return %arg0, %c0_i32, %c0_i32_0, %arg1 : i32, i32, i32, i32
  }
}

</mosaic_0001>

<bundles_post_ra>
// kernel: tpu_custom_call.1
= control target key start
LH: loop header
LB: loop body
LE: loop exit
PB: predicated region body
PF: predicated region fallthrough
CT: control target
= control target key end

     0   :  { %7 = vsyncpa [#allocation3], 0  ;;  %s1533_s0 = inlined_call_operand.hbm [shape: f32[8,128], index: 0, kind: input, shape index: {}]   ;;  %s1534_s1 = inlined_call_operand.hbm [shape: f32[2,8,16,128], index: 1, kind: input, shape index: {}]   ;;  %s1535_s2 = inlined_call_operand.hbm [shape: f32[2,8,16,128], index: 2, kind: output, shape index: {}]  }
   0x1   :  { %8 = vsyncpa [#allocation6], 0 }
   0x2   :  { %10 = vsyncpa [#allocation6 + $0x1], 0 }
   0x3   :  { %11 = vsyncpa [#allocation4], 0 }
   0x4   :  { %13 = vsyncpa [#allocation4 + $0x1], 0  ;;  %s1023_s9 = smov 0   ;;  %s1025_s10 = smov 0  }
   0x5   :  { %s1027_s11 = smov 0   ;;  %s1029_s12 = smov 0  }
   0x6   :  { %s1031_s13 = smov 0   ;;  %s1033_s14 = smov 0  }
   0x7 LB: > { %s755_s15 = sadd.s32 4294967295, %s1001_s14   ;;  %s756_s16 = sadd.s32 4294967294, %s1001_s14   ;;  %s1001_s14 = sphi %s1033_s14, %s19_s14   ;;  %s997_s13 = sphi %s1031_s13, %s1571_s13   ;;  %s993_s12 = sphi %s1029_s12, %s1570_s12   ;;  %s989_s11 = sphi %s1027_s11, %s1569_s11   ;;  %s985_s10 = sphi %s1025_s10, %s1568_s10   ;;  %s981_s9 = sphi %s1023_s9, %s1567_s9  }
   0x8   : > { %s61_s17 = sadd.s32 1, %s989_s11  ;;  %p68_p0 = scmp.ne.s32.totalorder %s989_s11, %s985_s10 }
   0x9   : > { %p69_p1 = scmp.eq.s32.totalorder %s1001_s14, 0  ;;  %p74_p2 = scmp.ne.s32.totalorder %s985_s10, %s981_s9 }
   0xa   : > { %p1061_p3 = scmp.eq.s32.totalorder %s755_s15, 0  ;;  %p100_p4 = scmp.eq.s32.totalorder %s755_s15, 1 }
   0xb   : > { %p1065_p5 = por %p69_p1, %p68_p0  ;;  %p106_p6 = scmp.eq.s32.totalorder %s756_s16, 1 }
   0xc   : > { %p1071_p7 = por %p1061_p3, %p74_p2  ;;  %p1075_p8 = por %p100_p4, %p68_p0 }
   0xd   : > { %p1079_p9 = por %p106_p6, %p74_p2  ;;  %p757_p10 = scmp.ge.s32.totalorder %s1001_s14, 1 }
   0xe   : > { %p113_p11 = scmp.lt.s32.totalorder %s1001_s14, 3  ;;  %s125_s25 = sshll.u32 %s1533_s0, 4  ;;  %s126_s25 = int_to_ptr.hbm [resolvable:$true] %s125_s25 }
   0xf   : > { %s1003_s27 = smov [#allocation2]   ;;  %p759_p13 = scmp.ge.s32.totalorder %s1001_s14, 2 }
  0x10   : > { %p1088_p12 = pnand %p757_p10, %p113_p11  ;;  %s127_s28 = sshll.u32 %s1003_s27, 4  ;;  %s128_s28 = int_to_ptr.vmem [resolvable:$true] %s127_s28 }
  0x11   : > { %p795_p1 = scmp.lt.s32.totalorder %s1001_s14, 2  ;;  %s31_s30 = sadd.s32 1, %s997_s13 }
  0x12   : > { %p782_p0 = pneg %p1088_p12  ;;  %p33_p6 = scmp.ge.s32.totalorder %s31_s30, 2 }
  0x13   : > { %p1100_p4 = pnand %p795_p1, %p1065_p5  ;;  %s138_s3 = sand.u32 1, %s989_s11  }
  0x14   : > { %p783_p2 = pnand %p782_p0, %p1061_p3  ;;  %s1573_s30 = smov (%p33_p6, %s31_s30), 0 }
  0x15   : > { %s760_s4 = sshll.u32 %s138_s3, 7  ;;  %s56_s5 = ssub.s32 %s997_s13, %s1573_s30 }
  0x16   : > { %785 = dma.hbm_to_vmem [thread:$0]  (!%p783_p2), %s126_s25, 128, %s128_s28, [#allocation3]  }
  0x17   : > { %p59_p10 = scmp.eq.s32.totalorder %s56_s5, 0  ;;  %s772_s6 = sshll.u32 %s997_s13, 7 }
  0x18   : > { %s148_s15 = scalar_lea.hbm %s1534_s1, %s772_s6  ;;  %s142_s16 = scalar_lea.vmem [#allocation5], %s760_s4 }
  0x19   : > { %s151_s19 = sshll.u32 %s142_s16, 4  ;;  %s149_s24 = sshll.u32 %s148_s15, 4  ;;  %s152_s19 = int_to_ptr.vmem [resolvable:$true] %s151_s19  ;;  %s150_s24 = int_to_ptr.hbm [resolvable:$true] %s149_s24 }
  0x1a   : > { %s1117_s23 = scalar_select %p59_p10, %s989_s11, %s61_s17  }
  0x1b   : > { %s139_s25 = scalar_lea.sflag [#allocation6], %s138_s3  ;;  %s1004_s27 = smov 128  }
  0x1c   : > { %s1005_s28 = smov 8   ;;  %163 = sbr.rel (%p1088_p12) target bundleno = 320 (0x140), region = 28 }
  0x1d   : > { %789 = dma.hbm_to_vmem [thread:$0]  (!%p1100_p4), %s150_s24, 2048, %s152_s19, %s139_s25, %s1004_s27, %s1004_s27, %s1005_s28  }
  0x21   : > { %968 = dma.done.wait (%p1061_p3), [#allocation3], 128  }
  0x22   : > { %970 = vsyncadd (%p1061_p3), [#allocation3], 4294967168  ;;  %s1128_s17 = sand.u32 1, %s985_s10  }
  0x23   : > { %s765_s3 = sshll.u32 %s1128_s17, 7  ;;  %s171_s4 = scalar_lea.sflag [#allocation6], %s1128_s17 }
  0x24   : > { %s1134_s29 = scalar_lea.vmem [#allocation5], %s765_s3 }
  0x25   : > { %972 = dma.done.wait (%p1071_p7), %s171_s4, 2048  }
  0x26   : > { %974 = vsyncadd (%p1071_p7), %s171_s4, 4294965248  ;;  %v1141_v0 = vld [vmem:[%s1134_s29 + $0x78] sm:$0xff]  ;;  %v1144_v1 = vld [vmem:[%s1134_s29 + $0x70] sm:$0xff]  ;;  %s1465_s18 = scalar_lea.vmem [#allocation7], %s765_s3  ;;  %s773_s20 = sshll.u32 %s993_s12, 7 }
  0x27   : > { %v1147_v2 = vld [vmem:[%s1134_s29 + $0x68] sm:$0xff]  ;;  %v1150_v3 = vand.u32 4294901760, %v1141_v0  ;;  %v1153_v4 = vand.u32 4294901760, %v1144_v1  ;;  %v1159_v6 = vld [vmem:[%s1134_s29 + $0x60] sm:$0xff]  ;;  %v1162_v7 = vld [vmem:[%s1134_s29 + $0x58] sm:$0xff]  ;;  %s654_s6 = scalar_lea.hbm %s1535_s2, %s773_s20  ;;  %s655_s12 = sshll.u32 %s1465_s18, 4  ;;  %s656_s12 = int_to_ptr.vmem [resolvable:$true] %s655_s12 }
  0x28   : > { %v1156_v5 = vand.u32 4294901760, %v1147_v2  ;;  %v1165_v8 = vld [vmem:[%s1134_s29 + $0x50] sm:$0xff]  ;;  %v1168_v9 = vand.u32 4294901760, %v1159_v6  ;;  %v1171_v10 = vand.u32 4294901760, %v1162_v7  ;;  %v1177_v12 = vld [vmem:[%s1134_s29 + $0x48] sm:$0xff]  ;;  %v1180_v13 = vld [vmem:[%s1134_s29 + $0x40] sm:$0xff] }
  0x29   : > { %v1174_v11 = vand.u32 4294901760, %v1165_v8  ;;  %214 = vmatpush.msra.mxu0 %v1150_v3  ;;  %v1185_v14 = vsub.f32 %v1141_v0, %v1150_v3  ;;  %v1189_v15 = vsub.f32 %v1144_v1, %v1153_v4  ;;  %v1196_v17 = vand.u32 4294901760, %v1177_v12  ;;  %v1199_v18 = vld [vmem:[%s1134_s29 + $0x38] sm:$0xff]  ;;  %410 = vmatpush.msra.mxu3 %v1150_v3  ;;  %v1222_v26 = vld [vmem:[%s1134_s29 + $0x30] sm:$0xff]  ;;  %v1251_v36 = vld [vmem:[%s1134_s29 + $0x28] sm:$0xff]  ;;  %s657_s7 = sshll.u32 %s654_s6, 4  ;;  %s658_s7 = int_to_ptr.hbm [resolvable:$true] %s657_s7 }
  0x2a   : > { %v1193_v16 = vsub.f32 %v1147_v2, %v1156_v5  ;;  %v1204_v19 = vsub.f32 %v1159_v6, %v1168_v9  ;;  %v1208_v20 = vsub.f32 %v1162_v7, %v1171_v10  ;;  %v1219_v25 = vand.u32 4294901760, %v1180_v13  ;;  %v1265_v42 = vld [vmem:[%s1134_s29 + $0x20] sm:$0xff]  ;;  %v1280_v47 = vld [vmem:[%s1134_s29 + $0x18] sm:$0xff]  ;;  %v1303_v55 = vld [vmem:[%s1134_s29 + $0x10] sm:$0xff]  ;;  %s642_s8 = scalar_lea.sflag [#allocation4], %s1128_s17  ;;  %s929_s15 = sshra.s32 %s658_s7, 4  ;;  %s930_s15 = int_to_ptr.hbm [resolvable:$true] %s929_s15 }
  0x2b   : > { %v1212_v21 = vsub.f32 %v1165_v8, %v1174_v11  ;;  %216 = vmatpush.msra.mxu0 %v1153_v4  ;;  %v256_v22 = vand.u32 4294901760, %v1185_v14  ;;  %v262_v23 = vand.u32 4294901760, %v1189_v15  ;;  %357 = vmatpush.msra.mxu2 %v1185_v14  ;;  %v1227_v28 = vand.u32 4294901760, %v1199_v18  ;;  %v1314_v60 = vld [vmem:[%s1134_s29 + $0x8] sm:$0xff]  ;;  %s931_s16 = scalar_lea.hbm %s930_s15, 128  ;;  %s935_s25 = scalar_lea.hbm %s1535_s2, 256 }
  0x2c   : > { %v1546_v24 = vand.u32 4294901760, %v1193_v16  ;;  %v1544_v27 = vand.u32 4294901760, %v1204_v19  ;;  %v1231_v29 = vsub.f32 %v1177_v12, %v1196_v17  ;;  %412 = vmatpush.msra.mxu3 %v1153_v4  ;;  %v1542_v33 = vand.u32 4294901760, %v1208_v20  ;;  %p932_p3 = scmp.ne.s32.totalorder %s930_s15, %s931_s16  ;;  %p936_p11 = scmp.lt.s32.totalorder %s930_s15, %s1535_s2 }
  0x2d   : > { %218 = vmatpush.msra.mxu0 %v1156_v5  ;;  %v257_v30 = vsub.f32 %v1185_v14, %v256_v22  ;;  %v263_v31 = vsub.f32 %v1189_v15, %v262_v23  ;;  %360 = vmatpush.msra.mxu2 %v1189_v15  ;;  %v1540_v34 = vand.u32 4294901760, %v1212_v21  ;;  %v1248_v35 = vand.u32 4294901760, %v1222_v26  ;;  %p937_p12 = scmp.lt.s32.totalorder %s935_s25, %s931_s16 }
  0x2e   : > { %v269_v32 = vsub.f32 %v1193_v16, %v1546_v24  ;;  %414 = vmatpush.msra.mxu3 %v1156_v5  ;;  %v275_v39 = vsub.f32 %v1204_v19, %v1544_v27  ;;  %v1260_v40 = vsub.f32 %v1180_v13, %v1219_v25  ;;  %v1538_v41 = vand.u32 4294901760, %v1231_v29  ;;  %p933_p5 = pnand %p932_p3, %p1075_p8 }
  0x2f   : > { %v258_v37 = vand.u32 4294901760, %v257_v30  ;;  %220 = vmatpush.msra.mxu0 %v1168_v9  ;;  %v264_v38 = vand.u32 4294901760, %v263_v31  ;;  %363 = vmatpush.msra.mxu2 %v1193_v16  ;;  %v281_v44 = vsub.f32 %v1208_v20, %v1542_v33  ;;  %v1273_v45 = vand.u32 4294901760, %v1251_v36  ;;  %v1331_v31 = vld [vmem:[%s1134_s29] sm:$0xff]  ;;  %p938_p0 = por %p937_p12, %p936_p11 }
  0x30   : > { %416 = vmatpush.msra.mxu3 %v1168_v9  ;;  %v270_v43 = vand.u32 4294901760, %v269_v32  ;;  %v1277_v46 = vsub.f32 %v1199_v18, %v1227_v28  ;;  %v287_v48 = vsub.f32 %v1212_v21, %v1540_v34  ;;  %v276_v49 = vand.u32 4294901760, %v275_v39  ;;  %p934_p7 = pneg %p933_p5 }
  0x31   : > { %259 = vmatpush.msra.mxu1 %v258_v37  ;;  %222 = vmatpush.msra.mxu0 %v1171_v10  ;;  %v1537_v50 = vand.u32 4294901760, %v1260_v40  ;;  %v1290_v51 = vand.u32 4294901760, %v1265_v42  ;;  %v1294_v52 = vsub.f32 %v1222_v26, %v1248_v35  ;;  %v293_v53 = vsub.f32 %v1231_v29, %v1538_v41 }
  0x32   : > { %366 = vmatpush.msra.mxu2 %v1204_v19  ;;  %418 = vmatpush.msra.mxu3 %v1171_v10  ;;  %v1300_v54 = vand.u32 4294901760, %v1280_v47  ;;  %v282_v56 = vand.u32 4294901760, %v281_v44  ;;  %v1536_v57 = vand.u32 4294901760, %v1277_v46  ;;  %v1311_v58 = vsub.f32 %v1251_v36, %v1273_v45  ;;  %p939_p1 = pnand %p938_p0, %p934_p7 }
  0x33   : > { %265 = vmatpush.msra.mxu1 %v264_v38  ;;  %224 = vmatpush.msra.mxu0 %v1174_v11  ;;  %v288_v59 = vand.u32 4294901760, %v287_v48  ;;  %v299_v61 = vsub.f32 %v1260_v40, %v1537_v50  ;;  %v1539_v62 = vand.u32 4294901760, %v1294_v52  ;;  %v1324_v63 = vand.u32 4294901760, %v1303_v55  ;;  %v212_v38 = vld [vmem:[#allocation2] sm:$0xff] }
  0x34   : > { %369 = vmatpush.msra.mxu2 %v1208_v20  ;;  %420 = vmatpush.msra.mxu3 %v1174_v11  ;;  %v1328_v30 = vsub.f32 %v1265_v42, %v1290_v51  ;;  %v294_v32 = vand.u32 4294901760, %v293_v53  ;;  %v1335_v37 = vsub.f32 %v1280_v47, %v1300_v54  ;;  %v305_v39 = vsub.f32 %v1277_v46, %v1536_v57 }
  0x35   : > { %271 = vmatpush.msra.mxu1 %v270_v43  ;;  %226 = vmatpush.msra.mxu0 %v1196_v17  ;;  %v1541_v43 = vand.u32 4294901760, %v1311_v58  ;;  %v1345_v44 = vand.u32 4294901760, %v1314_v60  ;;  %v1347_v48 = vand.u32 4294901760, %v212_v38  ;;  %v300_v53 = vand.u32 4294901760, %v299_v61 }
  0x36   : > { %372 = vmatpush.msra.mxu2 %v1212_v21  ;;  %422 = vmatpush.msra.mxu3 %v1196_v17  ;;  %v1543_v57 = vand.u32 4294901760, %v1328_v30  ;;  %v1361_v50 = vsub.f32 %v1303_v55, %v1324_v63  ;;  %v1545_v41 = vand.u32 4294901760, %v1335_v37  ;;  %v1556_v14 = vand.u32 4294901760, %v1204_v19 }
  0x37   : > { %277 = vmatpush.msra.mxu1 %v276_v49  ;;  %228 = vmatpush.msra.mxu0 %v1219_v25  ;;  %v1350_v49 = vand.u32 4294901760, %v1331_v31  ;;  %v317_v61 = vsub.f32 %v1311_v58, %v1541_v43  ;;  %v246_v34 = vsub.f32 %v212_v38, %v1347_v48  ;;  %v1557_v15 = vand.u32 4294901760, %v1208_v20 }
  0x38   : > { %375 = vmatpush.msra.mxu2 %v1231_v29  ;;  %424 = vmatpush.msra.mxu3 %v1219_v25  ;;  %v1547_v43 = vand.u32 4294901760, %v1361_v50  ;;  %v1560_v19 = vand.u32 4294901760, %v1260_v40 }
  0x39   : > { %283 = vmatpush.msra.mxu1 %v282_v56  ;;  %230 = vmatpush.msra.mxu0 %v1227_v28  ;;  %v311_v56 = vsub.f32 %v1294_v52, %v1539_v62  ;;  %v1372_v62 = vsub.f32 %v1314_v60, %v1345_v44  ;;  %v1384_v33 = vsub.f32 %v1331_v31, %v1350_v49  ;;  %v318_v38 = vand.u32 4294901760, %v317_v61 }
  0x3a   : > { %378 = vmatpush.msra.mxu2 %v1260_v40  ;;  %426 = vmatpush.msra.mxu3 %v1227_v28 }
  0x3b   : > { %289 = vmatpush.msra.mxu1 %v288_v59  ;;  %232 = vmatpush.msra.mxu0 %v1248_v35  ;;  %v306_v59 = vand.u32 4294901760, %v305_v39  ;;  %v323_v39 = vsub.f32 %v1328_v30, %v1543_v57  ;;  %v247_v57 = vand.u32 4294901760, %v246_v34  ;;  %v346_v61 = vand.u32 4294901760, %v1384_v33 }
  0x3c   : > { %381 = vmatpush.msra.mxu2 %v1277_v46  ;;  %428 = vmatpush.msra.mxu3 %v1248_v35 }
  0x3d   : > { %295 = vmatpush.msra.mxu1 %v294_v32  ;;  %234 = vmatpush.msra.mxu0 %v1273_v45  ;;  %v312_v32 = vand.u32 4294901760, %v311_v56  ;;  %v340_v56 = vand.u32 4294901760, %v1372_v62  ;;  %v324_v27 = vand.u32 4294901760, %v323_v39 }
  0x3e   : > { %384 = vmatpush.msra.mxu2 %v1294_v52  ;;  %430 = vmatpush.msra.mxu3 %v1273_v45 }
  0x3f   : > { %301 = vmatpush.msra.mxu1 %v300_v53  ;;  %236 = vmatpush.msra.mxu0 %v1290_v51  ;;  %v329_v53 = vsub.f32 %v1335_v37, %v1545_v41  ;;  %v341_v24 = vsub.f32 %v1372_v62, %v340_v56 }
  0x40   : > { %387 = vmatpush.msra.mxu2 %v1311_v58  ;;  %432 = vmatpush.msra.mxu3 %v1290_v51 }
  0x41   : > { %307 = vmatpush.msra.mxu1 %v306_v59  ;;  %238 = vmatpush.msra.mxu0 %v1300_v54  ;;  %v335_v59 = vsub.f32 %v1361_v50, %v1547_v43  ;;  %v330_v41 = vand.u32 4294901760, %v329_v53  ;;  %v347_v43 = vsub.f32 %v1384_v33, %v346_v61 }
  0x42   : > { %390 = vmatpush.msra.mxu2 %v1328_v30  ;;  %434 = vmatpush.msra.mxu3 %v1300_v54 }
  0x43   : > { %313 = vmatpush.msra.mxu1 %v312_v32  ;;  %240 = vmatpush.msra.mxu0 %v1324_v63  ;;  %v248_v32 = vsub.f32 %v246_v34, %v247_v57  ;;  %v336_v39 = vand.u32 4294901760, %v335_v59  ;;  %v1555_v59 = vand.u32 4294901760, %v1193_v16  ;;  %v1559_v16 = vand.u32 4294901760, %v1231_v29 }
  0x44   : > { %393 = vmatpush.msra.mxu2 %v1335_v37  ;;  %436 = vmatpush.msra.mxu3 %v1324_v63 }
  0x45   : > { %319 = vmatpush.msra.mxu1 %v318_v38  ;;  %242 = vmatpush.msra.mxu0 %v1345_v44  ;;  %v342_v38 = vand.u32 4294901760, %v341_v24  ;;  %v249_v53 = vand.u32 4294901760, %v248_v32 }
  0x46   : > { %396 = vmatpush.msra.mxu2 %v1361_v50  ;;  %438 = vmatpush.msra.mxu3 %v1345_v44 }
  0x47   : > { %325 = vmatpush.msra.mxu1 %v324_v27  ;;  %244 = vmatpush.msra.mxu0 %v1350_v49  ;;  %v348_v27 = vand.u32 4294901760, %v347_v43 }
  0x48   : > { %399 = vmatpush.msra.mxu2 %v1372_v62  ;;  %440 = vmatpush.msra.mxu3 %v1350_v49 }
  0x49   : > { %451 = vmatpush.msrb.mxu0 %v256_v22  ;;  %331 = vmatpush.msra.mxu1 %v330_v41  ;;  %v1558_v22 = vand.u32 4294901760, %v1212_v21 }
  0x4a   : > { %402 = vmatpush.msra.mxu2 %v1384_v33  ;;  %444 = vmatmul.f32.vlgmr.msra.gmra.mxu3 %v247_v57 }
  0x4b   : > { %455 = vmatpush.msrb.mxu0 %v262_v23  ;;  %337 = vmatpush.msra.mxu1 %v336_v39 }
  0x4c   : > { %405 = vmatmul.f32.vlgmr.msra.gmra.mxu2 %v246_v34  ;;  %250 = vmatmul.f32.vlgmr.msra.gmra.mxu0 %v249_v53 }
  0x4d   : > { %459 = vmatpush.msrb.mxu0 %v1555_v59  ;;  %343 = vmatpush.msra.mxu1 %v342_v38 }
  0x4f   : > { %463 = vmatpush.msrb.mxu0 %v1556_v14  ;;  %349 = vmatpush.msra.mxu1 %v348_v27 }
  0x50   : > { %351 = vmatmul.f32.vlgmr.msra.gmra.mxu1 %v1347_v48 }
  0x51   : > { %518 = vmatpush.msrb.mxu1 %v1150_v3  ;;  %467 = vmatpush.msrb.mxu0 %v1557_v15  ;;  %v1561_v3 = vand.u32 4294901760, %v1277_v46 }
  0x53   : > { %520 = vmatpush.msrb.mxu1 %v1153_v4  ;;  %471 = vmatpush.msrb.mxu0 %v1558_v22  ;;  %v1562_v4 = vand.u32 4294901760, %v1294_v52 }
  0x55   : > { %522 = vmatpush.msrb.mxu1 %v1156_v5  ;;  %475 = vmatpush.msrb.mxu0 %v1559_v16  ;;  %v1563_v5 = vand.u32 4294901760, %v1311_v58 }
  0x57   : > { %524 = vmatpush.msrb.mxu1 %v1168_v9  ;;  %479 = vmatpush.msrb.mxu0 %v1560_v19  ;;  %v1564_v9 = vand.u32 4294901760, %v1328_v30 }
  0x59   : > { %526 = vmatpush.msrb.mxu1 %v1171_v10  ;;  %483 = vmatpush.msrb.mxu0 %v1561_v3  ;;  %v1565_v10 = vand.u32 4294901760, %v1335_v37 }
  0x5b   : > { %528 = vmatpush.msrb.mxu1 %v1174_v11  ;;  %487 = vmatpush.msrb.mxu0 %v1562_v4  ;;  %v1566_v11 = vand.u32 4294901760, %v1361_v50 }
  0x5d   : > { %530 = vmatpush.msrb.mxu1 %v1196_v17  ;;  %491 = vmatpush.msrb.mxu0 %v1563_v5 }
  0x5f   : > { %532 = vmatpush.msrb.mxu1 %v1219_v25  ;;  %495 = vmatpush.msrb.mxu0 %v1564_v9 }
  0x61   : > { %534 = vmatpush.msrb.mxu1 %v1227_v28  ;;  %499 = vmatpush.msrb.mxu0 %v1565_v10 }
  0x63   : > { %536 = vmatpush.msrb.mxu1 %v1248_v35  ;;  %503 = vmatpush.msrb.mxu0 %v1566_v11 }
  0x65   : > { %538 = vmatpush.msrb.mxu1 %v1273_v45  ;;  %507 = vmatpush.msrb.mxu0 %v340_v56 }
  0x67   : > { %540 = vmatpush.msrb.mxu1 %v1290_v51  ;;  %511 = vmatpush.msrb.mxu0 %v346_v61 }
  0x68   : > { %513 = vmatmul.f32.vlgmr.msrb.gmra.mxu0 %v1347_v48 }
  0x69   : > { %542 = vmatpush.msrb.mxu1 %v1300_v54 }
  0x6b   : > { %544 = vmatpush.msrb.mxu1 %v1324_v63 }
  0x6d   : > { %546 = vmatpush.msrb.mxu1 %v1345_v44 }
  0x6f   : > { %548 = vmatpush.msrb.mxu1 %v1350_v49 }
  0x70   : > { %550 = vmatmul.f32.vlgmr.msrb.gmra.mxu1 %v1347_v48 }
  0xc9   : > { %v251_v20 = vpop.f32.mrf.mxu0 }
  0xcd   : > { %v352_v17 = vpop.f32.mrf.mxu1  ;;  %v445_v25 = vpop.f32.mrf.mxu3 }
  0xce   : > { %v353_v21 = vadd.f32 %v352_v17, %v251_v20 }
  0xcf   : > { %v406_v23 = vpop.f32.mrf.mxu2 }
  0xd0   : > { %v407_v24 = vadd.f32 %v406_v23, %v353_v21 }
  0xd2   : > { %v446_v28 = vadd.f32 %v445_v25, %v407_v24 }
  0xe5   : > { %v514_v29 = vpop.f32.mrf.mxu0 }
  0xe6   : > { %v515_v33 = vadd.f32 %v514_v29, %v446_v28 }
  0xed   : > { %v551_v34 = vpop.f32.mrf.mxu1 }
  0xee   : > { %v552_v35 = vadd.f32 %v551_v34, %v515_v33 }
  0xf0   : > { %v554_v40 = vrot.slane %v552_v35, 4 }
  0xf2   : > { %v555_v41 = vmax.f32 %v552_v35, %v554_v40 }
  0xf4   : > { %v556_v45 = vrot.slane %v555_v41, 2 }
  0xf6   : > { %v557_v46 = vmax.f32 %v555_v41, %v556_v45 }
  0xf8   : > { %v558_v50 = vrot.slane %v557_v46, 1 }
  0xfa   : > { %v559_v51 = vmax.f32 %v557_v46, %v558_v50 }
  0xfc   : > { %v560_v52 = vsub.f32 %v552_v35, %v559_v51 }
  0xfe   : > { %v561_v54 = vmul.f32 1.442695, %v560_v52 }
 0x100   : > { %851 = vpow2.f32 %v561_v54 }
 0x106   : > { %v852_v57 = vpop.eup %851 }
 0x107   : > { %v563_v58 = vrot.slane %v852_v57, 4 }
 0x109   : > { %v564_v62 = vadd.f32 %v852_v57, %v563_v58 }
 0x10b   : > { %v565_v63 = vrot.slane %v564_v62, 2 }
 0x10d   : > { %v566_v30 = vadd.f32 %v565_v63, %v564_v62 }
 0x10f   : > { %v567_v37 = vrot.slane %v566_v30, 1 }
 0x111   : > { %v568_v43 = vadd.f32 %v567_v37, %v566_v30 }
 0x113   : > { %853 = vrcp.f32 %v568_v43  ;;  %v580_v56 = vand.u32 2147483648, %v568_v43  ;;  %v578_v32 = vand.u32 2147483647, %v568_v43  ;;  %vm574_vm1 = vweird.f32 %v568_v43 }
 0x115   : > { %v581_v38 = vor.u32 1.1754944e-38, %v580_v56  ;;  %vm579_vm3 = vcmp.eq.f32.partialorder %v578_v32, 8.507059e+37 }
 0x119   : > { %v854_v44 = vpop.eup %853 }
 0x11a   : > { %v570_v48 = vmul.f32 %v854_v44, %v568_v43  ;;  %vm575_vm0 = vweird.f32 %v854_v44 }
 0x11b   : > { %vm576_vm2 = vmor %vm574_vm1, %vm575_vm0 }
 0x11c   : > { %v571_v49 = vsub.f32 1.0, %v570_v48 }
 0x11e   : > { %v572_v61 = vmul.f32 %v854_v44, %v571_v49 }
 0x120   : > { %v573_v39 = vadd.f32 %v854_v44, %v572_v61 }
 0x122   : > { %v577_v53 = vsel %vm576_vm2, %v854_v44, %v573_v39 }
 0x123   : > { %v582_v27 = vsel %vm579_vm3, %v581_v38, %v577_v53 }
 0x124   : > { %v583_v59 = vmul.f32 %v852_v57, %v582_v27 }
 0x126   : > { %v584_v14 = vmul.f32 16.0, %v583_v59 }
 0x128   : > { %v586_v15 = vrot.slane %v584_v14, 1  ;;  %v587_v22 = vrot.slane %v584_v14, 2  ;;  %v588_v16 = vrot.slane %v584_v14, 3  ;;  %v589_v19 = vrot.slane %v584_v14, 4 }
 0x129   : > { %v593_v3 = vperm.slane %v584_v14, 0  ;;  %v590_v9 = vrot.slane %v584_v14, 5  ;;  %v591_v23 = vrot.slane %v584_v14, 6 }
 0x12a   : > { %v594_v4 = vperm.slane %v586_v15, 0  ;;  %v595_v5 = vperm.slane %v587_v22, 0  ;;  %v596_v10 = vperm.slane %v588_v16, 0  ;;  %v597_v24 = vperm.slane %v589_v19, 0 }
 0x12b   : > { %v609_v11 = vmul.f32 %v593_v3, %v1331_v31  ;;  %v610_v17 = vmul.f32 %v593_v3, %v1314_v60  ;;  %v599_v28 = vperm.slane %v591_v23, 0 }
 0x12c   : > { %v611_v20 = vmul.f32 %v594_v4, %v1303_v55  ;;  %v612_v21 = vmul.f32 %v594_v4, %v1280_v47  ;;  %v613_v25 = vmul.f32 %v595_v5, %v1265_v42  ;;  %v614_v60 = vmul.f32 %v595_v5, %v1251_v36 }
 0x12d   : > { %625 = vst [vmem:[%s1465_s18] sm:$0xff] %v609_v11  ;;  %v592_v55 = vrot.slane %v584_v14, 7  ;;  %v598_v47 = vperm.slane %v590_v9, 0  ;;  %v615_v31 = vmul.f32 %v596_v10, %v1222_v26  ;;  %v616_v42 = vmul.f32 %v596_v10, %v1199_v18 }
 0x12e   : > { %626 = vst [vmem:[%s1465_s18 + $0x8] sm:$0xff] %v610_v17  ;;  %v617_v29 = vmul.f32 %v597_v24, %v1180_v13  ;;  %v618_v36 = vmul.f32 %v597_v24, %v1177_v12  ;;  %v621_v13 = vmul.f32 %v599_v28, %v1159_v6  ;;  %v622_v12 = vmul.f32 %v599_v28, %v1147_v2 }
 0x12f   : > { %627 = vst [vmem:[%s1465_s18 + $0x10] sm:$0xff] %v611_v20  ;;  %v600_v33 = vperm.slane %v592_v55, 0  ;;  %v619_v26 = vmul.f32 %v598_v47, %v1165_v8  ;;  %v620_v18 = vmul.f32 %v598_v47, %v1162_v7 }
 0x130   : > { %628 = vst [vmem:[%s1465_s18 + $0x18] sm:$0xff] %v612_v21 }
 0x131   : > { %629 = vst [vmem:[%s1465_s18 + $0x20] sm:$0xff] %v613_v25  ;;  %v623_v8 = vmul.f32 %v600_v33, %v1144_v1  ;;  %v624_v34 = vmul.f32 %v600_v33, %v1141_v0 }
 0x132   : > { %630 = vst [vmem:[%s1465_s18 + $0x28] sm:$0xff] %v614_v60 }
 0x133   : > { %631 = vst [vmem:[%s1465_s18 + $0x30] sm:$0xff] %v615_v31 }
 0x134   : > { %632 = vst [vmem:[%s1465_s18 + $0x38] sm:$0xff] %v616_v42 }
 0x135   : > { %633 = vst [vmem:[%s1465_s18 + $0x40] sm:$0xff] %v617_v29 }
 0x136   : > { %634 = vst [vmem:[%s1465_s18 + $0x48] sm:$0xff] %v618_v36 }
 0x137   : > { %635 = vst [vmem:[%s1465_s18 + $0x50] sm:$0xff] %v619_v26 }
 0x138   : > { %636 = vst [vmem:[%s1465_s18 + $0x58] sm:$0xff] %v620_v18 }
 0x139   : > { %637 = vst [vmem:[%s1465_s18 + $0x60] sm:$0xff] %v621_v13 }
 0x13a   : > { %638 = vst [vmem:[%s1465_s18 + $0x68] sm:$0xff] %v622_v12 }
 0x13b   : > { %639 = vst [vmem:[%s1465_s18 + $0x70] sm:$0xff] %v623_v8 }
 0x13c   : > { %640 = vst [vmem:[%s1465_s18 + $0x78] sm:$0xff] %v624_v34 }
 0x13d   : > { %942 = shalt.err (!%p939_p1)
}
 0x13e   : > { %s1006_s17 = smov 128   ;;  %s1007_s3 = smov 8  }
 0x13f   : > { %780 = dma.vmem_to_hbm [thread:$0]  (%p1075_p8), %s656_s12, 2048, %s658_s7, %s642_s8, %s1006_s17, %s1006_s17, %s1007_s3  }
 0x140 PF: > { %s672_s4 = sand.u32 1, %s981_s9   ;;  %p791_p2 = pnand %p759_p13, %p1079_p9 }
 0x141   : > { %s673_s29 = scalar_lea.sflag [#allocation4], %s672_s4 }
 0x142   : > { %p792_p4 = pneg %p791_p2 }
 0x144   : > { %976 = dma.done.wait (%p792_p4), %s673_s29, 2048  }
 0x145   : > { %978 = vsyncadd (%p792_p4), %s673_s29, 4294965248  ;;  %s19_s14 = sadd.s32 1, %s1001_s14   ;;  %s1567_s9 = smov %s985_s10 }
 0x146   : > { %p16_p6 = scmp.ge.s32.totalorder %s19_s14, 4   ;;  %s1568_s10 = smov %s989_s11 }
 0x147   : > { %s1569_s11 = smov %s1117_s23  ;;  %s1570_s12 = smov %s997_s13 }
 0x148   : > { %s1571_s13 = smov %s1573_s30  ;;  %18 = sbr.rel (!%p16_p6) target bundleno = 7 (0x7), region = 78 }
 0x14d   :  { %679 = vsyncpa [#allocation3], 1 }
 0x14e   :  { %681 = vsyncpa [#allocation3 + $0x1], 1 }
 0x14f   :  { %682 = vsyncpa [#allocation6], 1 }
 0x150   :  { %684 = vsyncpa [#allocation6 + $0x1], 1 }
 0x151   :  { %685 = vsyncpa [#allocation4], 1 }
 0x152   :  { %687 = vsyncpa [#allocation4 + $0x1], 1 }

</bundles_post_ra>
